<compile_context>
chip_gen: v6e
topology: v6e:2x2x1
jax: 0.10.0
libtpu: 0.0.40
codegen_flags: <defaults>
</compile_context>

<pallas_src>
import functools
import math

import jax
import jax.numpy as jnp
from jax import lax
from jax.experimental import pallas as pl
from jax.experimental.pallas import tpu as pltpu

_LANES = 128     # vreg lane width: feature dims padded per-layer to this
_SUBLANES = 8    # sublane count: row-block BN needs 8-row aligned splits


def _round_up(v, m):
    return ((v + m - 1) // m) * m


def _pad2(a, rows, cols):
    return jnp.pad(a, ((0, rows - a.shape[0]), (0, cols - a.shape[1])))


# ----------------------------------------------------------------------------
# Fused kernel: input corruption + all L layers in one grid-less invocation.
# ----------------------------------------------------------------------------
def _ladder_encoder_kernel(*refs, layer_dims, n_labeled, noise, aligned,
                           mxu_dtype):
    L = len(layer_dims) - 1
    it = iter(refs)
    # --- inputs ---
    x_ref = next(it)
    eps0_ref = next(it)
    w_refs = [next(it) for _ in range(L)]
    beta_refs = [next(it) for _ in range(L)]
    gamma_last_ref = next(it)
    eps_refs = [next(it) for _ in range(L)]
    # --- outputs ---
    h0_ref = next(it)
    z_refs = [next(it) for _ in range(L)]
    m_refs = [next(it) for _ in range(L)]
    v_refs = [next(it) for _ in range(L)]
    h_last_ref = next(it)

    N = x_ref.shape[0]
    nl = n_labeled
    nu = N - n_labeled

    if not aligned:
        # Labeled-row weight (only needed on the masked fallback path).
        row = lax.broadcasted_iota(jnp.int32, (N, 1), 0)
        wl = (row < nl).astype(jnp.float32)

    # h0 = x + randn * noise  (noise is zero on padded lanes).
    h = x_ref[...] + noise * eps0_ref[...]
    h0_ref[...] = h

    for l in range(1, L + 1):           # static unroll: L is small & known
        idx = l - 1

        # ---- MXU ----  (operands pre-cast to mxu_dtype; f32 accumulation)
        z_pre = jnp.dot(h.astype(mxu_dtype), w_refs[idx][...],
                        preferred_element_type=jnp.float32)

        # ---- per-group batch statistics (two-pass, unbiased variance) ----
        if aligned:
            # Static row-block BN: slices land on (8,128) tile boundaries, so
            # everything is (1, D) broadcasts -- no masked full-tile work.
            z_pre_l = z_pre[:nl]
            z_pre_u = z_pre[nl:]
            mean_l = jnp.mean(z_pre_l, axis=0, keepdims=True)
            mean_u = jnp.mean(z_pre_u, axis=0, keepdims=True)
            cl = z_pre_l - mean_l
            cu = z_pre_u - mean_u
            var_l = jnp.sum(cl * cl, axis=0, keepdims=True) * (1.0 / (nl - 1))
            var_u = jnp.sum(cu * cu, axis=0, keepdims=True) * (1.0 / (nu - 1))
            inv_l = lax.rsqrt(var_l + 1e-10)       # EUP rsqrt
            inv_u = lax.rsqrt(var_u + 1e-10)
            z_norm = jnp.concatenate([cl * inv_l, cu * inv_u], axis=0)
        else:
            # Masked fallback for splits that are not sublane-aligned.
            sum_tot = jnp.sum(z_pre, axis=0, keepdims=True)
            sum_lab = jnp.sum(z_pre * wl, axis=0, keepdims=True)
            mean_l = sum_lab * (1.0 / nl)
            mean_u = (sum_tot - sum_lab) * (1.0 / nu)
            mean_sel = mean_u + wl * (mean_l - mean_u)
            c = z_pre - mean_sel
            csq = c * c
            ss_lab = jnp.sum(csq * wl, axis=0, keepdims=True)
            ss_tot = jnp.sum(csq, axis=0, keepdims=True)
            var_l = ss_lab * (1.0 / (nl - 1))
            var_u = (ss_tot - ss_lab) * (1.0 / (nu - 1))
            inv_l = lax.rsqrt(var_l + 1e-10)
            inv_u = lax.rsqrt(var_u + 1e-10)
            inv_sel = inv_u + wl * (inv_l - inv_u)
            z_norm = c * inv_sel

        z = z_norm + noise * eps_refs[idx][...]     # z += randn * noise
        z_refs[idx][...] = z
        m_refs[idx][...] = mean_u                   # d['unlabeled']['m'][l]
        v_refs[idx][...] = var_u                    # d['unlabeled']['v'][l]

        beta = beta_refs[idx][...]                  # (1, Dpad)
        a = z + beta
        if l == L:
            # F.softmax(gamma * (z + beta)) over features; padded lanes masked.
            gamma = gamma_last_ref[...]
            d_real = layer_dims[L]
            lane = lax.broadcasted_iota(jnp.int32, (1, a.shape[1]), 1)
            logits = jnp.where(lane < d_real, gamma * a, -1e30)
            mx = jnp.max(logits, axis=-1, keepdims=True)
            e = jnp.exp(logits - mx)
            h = e / jnp.sum(e, axis=-1, keepdims=True)   # exact divide
            h_last_ref[...] = h
        else:
            h = jnp.maximum(a, 0.0)
            # Intermediate h is NOT stored; host recomputes relu(z + beta).


# ----------------------------------------------------------------------------
# Host-side wrapper
# ----------------------------------------------------------------------------
def init_encoder_params(layer_sizes, key):
    """W[l] ~ randn(s) / sqrt(s[0]); gamma = ones; beta = zeros (torch init)."""
    params = []
    shapes = list(zip(layer_sizes[:-1], layer_sizes[1:]))
    keys = jax.random.split(key, len(shapes))
    for k, s in zip(keys, shapes):
        W = jax.random.normal(k, s, dtype=jnp.float32) / math.sqrt(s[0])
        gamma = jnp.ones((s[1],), dtype=jnp.float32)
        beta = jnp.zeros((s[1],), dtype=jnp.float32)
        params.append((W, gamma, beta))
    return params


def _make_noise(key, N, dims):
    """One standard-normal array per layer level (real widths)."""
    keys = jax.random.split(key, len(dims))
    return [jax.random.normal(k, (N, d), dtype=jnp.float32)
            for k, d in zip(keys, dims)]


def encoder_forward(x, params, *, noise, batch_size, key):
    """Training-mode forward with corruption noise > 0, in one fused kernel."""
    assert noise > 0.0, "only the training / noise > 0 branch is implemented"
    N, d0 = x.shape
    L = len(params)
    dims = [int(d0)] + [int(W.shape[1]) for (W, _, _) in params]
    dims_pad = [_round_up(d, _LANES) for d in dims]
    nl, nu = int(batch_size), N - int(batch_size)
    # Unbiased variance divides by (n - 1): need >= 2 rows per split.
    assert nl >= 2 and nu >= 2, "need >=2 labeled and >=2 unlabeled rows"
    aligned = (nl % _SUBLANES == 0) and (nu % _SUBLANES == 0)

    # bf16 MXU operands only pay off at realistic layer widths; keep f32 at
    # toy sizes so numerics stay tight.
    mxu_dtype = jnp.bfloat16 if max(dims_pad) >= 512 else jnp.float32

    # Host-side corruption noise (real widths; padded lanes stay zero-noise).
    eps = _make_noise(key, N, dims)

    # Per-layer lane-dense padding (no global dpad).
    x_pad = _pad2(x.astype(jnp.float32), N, dims_pad[0])
    eps_pad = [_pad2(e, N, dp) for e, dp in zip(eps, dims_pad)]
    w_in = [_pad2(W, dims_pad[l], dims_pad[l + 1]).astype(mxu_dtype)
            for l, (W, _, _) in enumerate(params)]
    beta_in = [_pad2(b.reshape(1, -1), 1, dims_pad[l + 1])
               for l, (_, _, b) in enumerate(params)]
    gamma_last = _pad2(params[-1][1].reshape(1, -1), 1, dims_pad[L])

    inputs = [x_pad, eps_pad[0]] + w_in + beta_in + [gamma_last] + eps_pad[1:]

    out_shapes = (
        [jax.ShapeDtypeStruct((N, dims_pad[0]), jnp.float32)]                        # h0
        + [jax.ShapeDtypeStruct((N, dims_pad[l]), jnp.float32) for l in range(1, L + 1)]   # z_l
        + [jax.ShapeDtypeStruct((1, dims_pad[l]), jnp.float32) for l in range(1, L + 1)]   # m_l
        + [jax.ShapeDtypeStruct((1, dims_pad[l]), jnp.float32) for l in range(1, L + 1)]   # v_l
        + [jax.ShapeDtypeStruct((N, dims_pad[L]), jnp.float32)])                      # h_L

    # VMEM budget from actual resident footprint + headroom (not a fixed cap).
    total_bytes = (sum(a.size * a.dtype.itemsize for a in inputs)
                   + sum(math.prod(s.shape) * s.dtype.itemsize for s in out_shapes))
    # TODO(synk): make the upper cap generation-aware (v7x 64 MiB vs 128 MiB).
    vmem_limit = min(max(16 * 1024 * 1024, int(2.5 * total_bytes)),
                     96 * 1024 * 1024)

    kernel = functools.partial(
        _ladder_encoder_kernel,
        layer_dims=tuple(dims), n_labeled=nl, noise=float(noise),
        aligned=aligned, mxu_dtype=mxu_dtype)

    vmem = pl.BlockSpec(memory_space=pltpu.MemorySpace.VMEM)

    outs = pl.pallas_call(
        kernel,
        in_specs=[vmem] * len(inputs),
        out_specs=tuple([vmem] * len(out_shapes)),
        out_shape=tuple(out_shapes),
        compiler_params=pltpu.CompilerParams(vmem_limit_bytes=vmem_limit),
    )(*inputs)

    outs = list(outs)
    h0_pad = outs[0]
    z_pad = outs[1:1 + L]
    m_pad = outs[1 + L:1 + 2 * L]
    v_pad = outs[1 + 2 * L:1 + 3 * L]
    hL_pad = outs[1 + 3 * L]

    # Slice padded lanes off; recompute intermediate h on the host (cheap and
    # deterministic) so the kernel only stores h0, z, m, v and the final h.
    h_real = [None] * (L + 1)
    h_real[0] = h0_pad[:, :dims[0]]
    z_real = [z_pad[l - 1][:, :dims[l]] for l in range(1, L + 1)]
    m_real = [m_pad[l - 1][0, :dims[l]] for l in range(1, L + 1)]
    v_real = [v_pad[l - 1][0, :dims[l]] for l in range(1, L + 1)]
    for l in range(1, L):
        h_real[l] = jnp.maximum(z_real[l - 1] + params[l - 1][2], 0.0)
    h_real[L] = hL_pad[:, :dims[L]]

    split_lu = lambda t: (t[:nl], t[nl:])
    d = {'labeled': {'z': {}, 'm': {}, 'v': {}, 'h': {}},
         'unlabeled': {'z': {}, 'm': {}, 'v': {}, 'h': {}}}
    d['labeled']['z'][0], d['unlabeled']['z'][0] = split_lu(h_real[0])
    for l in range(1, L + 1):
        d['labeled']['h'][l - 1], d['unlabeled']['h'][l - 1] = split_lu(h_real[l - 1])
        d['labeled']['z'][l], d['unlabeled']['z'][l] = split_lu(z_real[l - 1])
        d['unlabeled']['m'][l] = m_real[l - 1]
        d['unlabeled']['v'][l] = v_real[l - 1]
    d['labeled']['h'][L], d['unlabeled']['h'][L] = split_lu(h_real[L])
    return h_real[L], d


# ----------------------------------------------------------------------------
# Pure-JAX reference (mirrors torch Encoder.forward, same host noise stream).
# ----------------------------------------------------------------------------
def encoder_reference(x, params, *, noise, batch_size, key):
    N, d0 = x.shape
    L = len(params)
    dims = [int(d0)] + [int(W.shape[1]) for (W, _, _) in params]
    eps = _make_noise(key, N, dims)
    bs = batch_size
    join = lambda a, b: jnp.concatenate([a, b], axis=0)

    def bn(batch, mean=None, var=None):
        if mean is None or var is None:
            mean = jnp.mean(batch, axis=0)
            var = jnp.var(batch, axis=0, ddof=1)
        return (batch - mean) / jnp.sqrt(var + 1e-10)

    h = x + noise * eps[0]
    d = {'labeled': {'z': {}, 'm': {}, 'v': {}, 'h': {}},
         'unlabeled': {'z': {}, 'm': {}, 'v': {}, 'h': {}}}
    d['labeled']['z'][0], d['unlabeled']['z'][0] = h[:bs], h[bs:]
    for l in range(1, L + 1):
        W, gamma, beta = params[l - 1]
        d['labeled']['h'][l - 1], d['unlabeled']['h'][l - 1] = h[:bs], h[bs:]
        z_pre = jnp.dot(h, W, precision=lax.Precision.HIGHEST)
        z_pre_l, z_pre_u = z_pre[:bs], z_pre[bs:]
        m = jnp.mean(z_pre_u, axis=0)
        v = jnp.var(z_pre_u, axis=0, ddof=1)
        z = join(bn(z_pre_l), bn(z_pre_u, m, v)) + noise * eps[l]
        if l == L:
            h = jax.nn.softmax(gamma * (z + beta), axis=-1)
        else:
            h = jax.nn.relu(z + beta)
        d['labeled']['z'][l], d['unlabeled']['z'][l] = z[:bs], z[bs:]
        d['unlabeled']['m'][l], d['unlabeled']['v'][l] = m, v
    d['labeled']['h'][L], d['unlabeled']['h'][L] = h[:bs], h[bs:]
    return h, d


# ----------------------------------------------------------------------------
if __name__ == "__main__":
    layer_sizes = [16, 32, 8]    # input dim 16, hidden 32, output (classes) 8
    batch_size = 8               # labeled rows; unlabeled rows = 8; N = 16 (8-row aligned)
    noise = 0.3
    L = len(layer_sizes) - 1

    root = jax.random.PRNGKey(0)
    k_param, k_data, k_noise = jax.random.split(root, 3)

    params = init_encoder_params(layer_sizes, k_param)
    x = jax.random.normal(k_data, (2 * batch_size, layer_sizes[0]), dtype=jnp.float32)

    h, d = encoder_forward(x, params, noise=noise, batch_size=batch_size, key=k_noise)
    h = jax.block_until_ready(h)

    assert h.shape == (2 * batch_size, layer_sizes[-1])
    assert bool(jnp.all(jnp.isfinite(h)))
    assert bool(jnp.allclose(jnp.sum(h, axis=-1), 1.0, atol=1e-4))  # exact softmax
    assert d['unlabeled']['m'][1].shape == (layer_sizes[1],)
    assert d['labeled']['z'][0].shape == (batch_size, layer_sizes[0])

    # Full end-to-end comparison against the pure-JAX reference (same noise).
    h_ref, d_ref = encoder_reference(x, params, noise=noise,
                                     batch_size=batch_size, key=k_noise)
    assert bool(jnp.allclose(h, h_ref, atol=2e-3, rtol=2e-3)), "final softmax mismatch"
    for l in range(1, L + 1):
        for grp in ('labeled', 'unlabeled'):
            assert bool(jnp.allclose(d[grp]['z'][l], d_ref[grp]['z'][l],
                                     atol=2e-3, rtol=2e-3)), f"z mismatch layer {l}"
            assert bool(jnp.allclose(d[grp]['h'][l], d_ref[grp]['h'][l],
                                     atol=2e-3, rtol=2e-3)), f"h mismatch layer {l}"
        assert bool(jnp.allclose(d['unlabeled']['m'][l], d_ref['unlabeled']['m'][l],
                                 atol=2e-3, rtol=2e-3)), f"m mismatch layer {l}"
        assert bool(jnp.allclose(d['unlabeled']['v'][l], d_ref['unlabeled']['v'][l],
                                 atol=2e-3, rtol=2e-3)), f"v mismatch layer {l}"

    print("KERNEL_OK")
</pallas_src>

<mosaic_0001>
module attributes {stable_mosaic.version = 11 : i64} {
  func.func @_ladder_encoder_kernel(%arg0: memref<16x128xf32, #tpu.memory_space<vmem>>, %arg1: memref<16x128xf32, #tpu.memory_space<vmem>>, %arg2: memref<128x128xf32, #tpu.memory_space<vmem>>, %arg3: memref<128x128xf32, #tpu.memory_space<vmem>>, %arg4: memref<1x128xf32, #tpu.memory_space<vmem>>, %arg5: memref<1x128xf32, #tpu.memory_space<vmem>>, %arg6: memref<1x128xf32, #tpu.memory_space<vmem>>, %arg7: memref<16x128xf32, #tpu.memory_space<vmem>>, %arg8: memref<16x128xf32, #tpu.memory_space<vmem>>, %arg9: memref<16x128xf32, #tpu.memory_space<vmem>>, %arg10: memref<16x128xf32, #tpu.memory_space<vmem>>, %arg11: memref<16x128xf32, #tpu.memory_space<vmem>>, %arg12: memref<1x128xf32, #tpu.memory_space<vmem>>, %arg13: memref<1x128xf32, #tpu.memory_space<vmem>>, %arg14: memref<1x128xf32, #tpu.memory_space<vmem>>, %arg15: memref<1x128xf32, #tpu.memory_space<vmem>>, %arg16: memref<16x128xf32, #tpu.memory_space<vmem>>) attributes {dimension_semantics = [], scalar_prefetch = 0 : i64, scratch_operands = 0 : i64, tpu.core_type = #tpu.core_type<tc>} {
    %c0 = arith.constant 0 : index
    %c0_0 = arith.constant 0 : index
    %0 = vector.load %arg0[%c0, %c0_0] : memref<16x128xf32, #tpu.memory_space<vmem>>, vector<16x128xf32>
    %c0_1 = arith.constant 0 : index
    %c0_2 = arith.constant 0 : index
    %1 = vector.load %arg1[%c0_1, %c0_2] : memref<16x128xf32, #tpu.memory_space<vmem>>, vector<16x128xf32>
    %cst = arith.constant 3.000000e-01 : f32
    %2 = vector.broadcast %cst : f32 to vector<16x128xf32>
    %3 = arith.mulf %2, %1 : vector<16x128xf32>
    %4 = arith.addf %0, %3 : vector<16x128xf32>
    %c0_3 = arith.constant 0 : index
    %c0_4 = arith.constant 0 : index
    %5 = vector.load %arg9[%c0_3, %c0_4] : memref<16x128xf32, #tpu.memory_space<vmem>>, vector<16x128xf32>
    tpu.vector_store %arg9[%c0_3, %c0_4], %4 {strides = array<i32>} : memref<16x128xf32, #tpu.memory_space<vmem>>, vector<16x128xf32>,
    %c0_5 = arith.constant 0 : index
    %c0_6 = arith.constant 0 : index
    %6 = vector.load %arg2[%c0_5, %c0_6] : memref<128x128xf32, #tpu.memory_space<vmem>>, vector<128x128xf32>
    %cst_7 = arith.constant dense<0.000000e+00> : vector<16x128xf32>
    %7 = tpu.matmul %4, %6, %cst_7 {dimension_numbers = #tpu.dot_dimension_numbers<[1], [0], [0], [1], [0, 0, 1, 1], [], []>} : vector<16x128xf32>, vector<128x128xf32>, vector<16x128xf32> -> vector<16x128xf32>
    %8 = vector.extract_strided_slice %7 {offsets = [0, 0], sizes = [8, 128], strides = [1, 1]} : vector<16x128xf32> to vector<8x128xf32>
    %9 = vector.extract_strided_slice %7 {offsets = [8, 0], sizes = [8, 128], strides = [1, 1]} : vector<16x128xf32> to vector<8x128xf32>
    %cst_8 = arith.constant dense<0.000000e+00> : vector<128xf32>
    %10 = vector.multi_reduction <add>, %8, %cst_8 [0] : vector<8x128xf32> to vector<128xf32>
    %11 = vector.shape_cast %10 : vector<128xf32> to vector<1x128xf32>
    %cst_9 = arith.constant 8.000000e+00 : f32
    %12 = vector.broadcast %cst_9 : f32 to vector<1x128xf32>
    %13 = arith.divf %11, %12 : vector<1x128xf32>
    %cst_10 = arith.constant dense<0.000000e+00> : vector<128xf32>
    %14 = vector.multi_reduction <add>, %9, %cst_10 [0] : vector<8x128xf32> to vector<128xf32>
    %15 = vector.shape_cast %14 : vector<128xf32> to vector<1x128xf32>
    %cst_11 = arith.constant 8.000000e+00 : f32
    %16 = vector.broadcast %cst_11 : f32 to vector<1x128xf32>
    %17 = arith.divf %15, %16 : vector<1x128xf32>
    %18 = vector.broadcast %13 : vector<1x128xf32> to vector<8x128xf32>
    %19 = arith.subf %8, %18 : vector<8x128xf32>
    %20 = vector.broadcast %17 : vector<1x128xf32> to vector<8x128xf32>
    %21 = arith.subf %9, %20 : vector<8x128xf32>
    %22 = arith.mulf %19, %19 : vector<8x128xf32>
    %cst_12 = arith.constant dense<0.000000e+00> : vector<128xf32>
    %23 = vector.multi_reduction <add>, %22, %cst_12 [0] : vector<8x128xf32> to vector<128xf32>
    %24 = vector.shape_cast %23 : vector<128xf32> to vector<1x128xf32>
    %cst_13 = arith.constant 0.142857149 : f32
    %25 = vector.broadcast %cst_13 : f32 to vector<1x128xf32>
    %26 = arith.mulf %24, %25 : vector<1x128xf32>
    %27 = arith.mulf %21, %21 : vector<8x128xf32>
    %cst_14 = arith.constant dense<0.000000e+00> : vector<128xf32>
    %28 = vector.multi_reduction <add>, %27, %cst_14 [0] : vector<8x128xf32> to vector<128xf32>
    %29 = vector.shape_cast %28 : vector<128xf32> to vector<1x128xf32>
    %cst_15 = arith.constant 0.142857149 : f32
    %30 = vector.broadcast %cst_15 : f32 to vector<1x128xf32>
    %31 = arith.mulf %29, %30 : vector<1x128xf32>
    %cst_16 = arith.constant 1.000000e-10 : f32
    %32 = vector.broadcast %cst_16 : f32 to vector<1x128xf32>
    %33 = arith.addf %26, %32 : vector<1x128xf32>
    %34 = math.rsqrt %33 : vector<1x128xf32>
    %cst_17 = arith.constant 1.000000e-10 : f32
    %35 = vector.broadcast %cst_17 : f32 to vector<1x128xf32>
    %36 = arith.addf %31, %35 : vector<1x128xf32>
    %37 = math.rsqrt %36 : vector<1x128xf32>
    %38 = vector.broadcast %34 : vector<1x128xf32> to vector<8x128xf32>
    %39 = arith.mulf %19, %38 : vector<8x128xf32>
    %40 = vector.broadcast %37 : vector<1x128xf32> to vector<8x128xf32>
    %41 = arith.mulf %21, %40 : vector<8x128xf32>
    %42 = tpu.concatenate %39, %41 in 0 : vector<8x128xf32>, vector<8x128xf32> -> vector<16x128xf32>
    %c0_18 = arith.constant 0 : index
    %c0_19 = arith.constant 0 : index
    %43 = vector.load %arg7[%c0_18, %c0_19] : memref<16x128xf32, #tpu.memory_space<vmem>>, vector<16x128xf32>
    %cst_20 = arith.constant 3.000000e-01 : f32
    %44 = vector.broadcast %cst_20 : f32 to vector<16x128xf32>
    %45 = arith.mulf %44, %43 : vector<16x128xf32>
    %46 = arith.addf %42, %45 : vector<16x128xf32>
    %c0_21 = arith.constant 0 : index
    %c0_22 = arith.constant 0 : index
    %47 = vector.load %arg10[%c0_21, %c0_22] : memref<16x128xf32, #tpu.memory_space<vmem>>, vector<16x128xf32>
    tpu.vector_store %arg10[%c0_21, %c0_22], %46 {strides = array<i32>} : memref<16x128xf32, #tpu.memory_space<vmem>>, vector<16x128xf32>,
    %c0_23 = arith.constant 0 : index
    %c0_24 = arith.constant 0 : index
    %48 = vector.load %arg12[%c0_23, %c0_24] : memref<1x128xf32, #tpu.memory_space<vmem>>, vector<1x128xf32>
    tpu.vector_store %arg12[%c0_23, %c0_24], %17 {strides = array<i32>} : memref<1x128xf32, #tpu.memory_space<vmem>>, vector<1x128xf32>,
    %c0_25 = arith.constant 0 : index
    %c0_26 = arith.constant 0 : index
    %49 = vector.load %arg14[%c0_25, %c0_26] : memref<1x128xf32, #tpu.memory_space<vmem>>, vector<1x128xf32>
    tpu.vector_store %arg14[%c0_25, %c0_26], %31 {strides = array<i32>} : memref<1x128xf32, #tpu.memory_space<vmem>>, vector<1x128xf32>,
    %c0_27 = arith.constant 0 : index
    %c0_28 = arith.constant 0 : index
    %50 = vector.load %arg4[%c0_27, %c0_28] : memref<1x128xf32, #tpu.memory_space<vmem>>, vector<1x128xf32>
    %51 = vector.broadcast %50 : vector<1x128xf32> to vector<16x128xf32>
    %52 = arith.addf %46, %51 : vector<16x128xf32>
    %cst_29 = arith.constant 0.000000e+00 : f32
    %53 = vector.broadcast %cst_29 : f32 to vector<16x128xf32>
    %54 = arith.maximumf %52, %53 : vector<16x128xf32>
    %c0_30 = arith.constant 0 : index
    %c0_31 = arith.constant 0 : index
    %55 = vector.load %arg3[%c0_30, %c0_31] : memref<128x128xf32, #tpu.memory_space<vmem>>, vector<128x128xf32>
    %cst_32 = arith.constant dense<0.000000e+00> : vector<16x128xf32>
    %56 = tpu.matmul %54, %55, %cst_32 {dimension_numbers = #tpu.dot_dimension_numbers<[1], [0], [0], [1], [0, 0, 1, 1], [], []>} : vector<16x128xf32>, vector<128x128xf32>, vector<16x128xf32> -> vector<16x128xf32>
    %57 = vector.extract_strided_slice %56 {offsets = [0, 0], sizes = [8, 128], strides = [1, 1]} : vector<16x128xf32> to vector<8x128xf32>
    %58 = vector.extract_strided_slice %56 {offsets = [8, 0], sizes = [8, 128], strides = [1, 1]} : vector<16x128xf32> to vector<8x128xf32>
    %cst_33 = arith.constant dense<0.000000e+00> : vector<128xf32>
    %59 = vector.multi_reduction <add>, %57, %cst_33 [0] : vector<8x128xf32> to vector<128xf32>
    %60 = vector.shape_cast %59 : vector<128xf32> to vector<1x128xf32>
    %cst_34 = arith.constant 8.000000e+00 : f32
    %61 = vector.broadcast %cst_34 : f32 to vector<1x128xf32>
    %62 = arith.divf %60, %61 : vector<1x128xf32>
    %cst_35 = arith.constant dense<0.000000e+00> : vector<128xf32>
    %63 = vector.multi_reduction <add>, %58, %cst_35 [0] : vector<8x128xf32> to vector<128xf32>
    %64 = vector.shape_cast %63 : vector<128xf32> to vector<1x128xf32>
    %cst_36 = arith.constant 8.000000e+00 : f32
    %65 = vector.broadcast %cst_36 : f32 to vector<1x128xf32>
    %66 = arith.divf %64, %65 : vector<1x128xf32>
    %67 = vector.broadcast %62 : vector<1x128xf32> to vector<8x128xf32>
    %68 = arith.subf %57, %67 : vector<8x128xf32>
    %69 = vector.broadcast %66 : vector<1x128xf32> to vector<8x128xf32>
    %70 = arith.subf %58, %69 : vector<8x128xf32>
    %71 = arith.mulf %68, %68 : vector<8x128xf32>
    %cst_37 = arith.constant dense<0.000000e+00> : vector<128xf32>
    %72 = vector.multi_reduction <add>, %71, %cst_37 [0] : vector<8x128xf32> to vector<128xf32>
    %73 = vector.shape_cast %72 : vector<128xf32> to vector<1x128xf32>
    %cst_38 = arith.constant 0.142857149 : f32
    %74 = vector.broadcast %cst_38 : f32 to vector<1x128xf32>
    %75 = arith.mulf %73, %74 : vector<1x128xf32>
    %76 = arith.mulf %70, %70 : vector<8x128xf32>
    %cst_39 = arith.constant dense<0.000000e+00> : vector<128xf32>
    %77 = vector.multi_reduction <add>, %76, %cst_39 [0] : vector<8x128xf32> to vector<128xf32>
    %78 = vector.shape_cast %77 : vector<128xf32> to vector<1x128xf32>
    %cst_40 = arith.constant 0.142857149 : f32
    %79 = vector.broadcast %cst_40 : f32 to vector<1x128xf32>
    %80 = arith.mulf %78, %79 : vector<1x128xf32>
    %cst_41 = arith.constant 1.000000e-10 : f32
    %81 = vector.broadcast %cst_41 : f32 to vector<1x128xf32>
    %82 = arith.addf %75, %81 : vector<1x128xf32>
    %83 = math.rsqrt %82 : vector<1x128xf32>
    %cst_42 = arith.constant 1.000000e-10 : f32
    %84 = vector.broadcast %cst_42 : f32 to vector<1x128xf32>
    %85 = arith.addf %80, %84 : vector<1x128xf32>
    %86 = math.rsqrt %85 : vector<1x128xf32>
    %87 = vector.broadcast %83 : vector<1x128xf32> to vector<8x128xf32>
    %88 = arith.mulf %68, %87 : vector<8x128xf32>
    %89 = vector.broadcast %86 : vector<1x128xf32> to vector<8x128xf32>
    %90 = arith.mulf %70, %89 : vector<8x128xf32>
    %91 = tpu.concatenate %88, %90 in 0 : vector<8x128xf32>, vector<8x128xf32> -> vector<16x128xf32>
    %c0_43 = arith.constant 0 : index
    %c0_44 = arith.constant 0 : index
    %92 = vector.load %arg8[%c0_43, %c0_44] : memref<16x128xf32, #tpu.memory_space<vmem>>, vector<16x128xf32>
    %cst_45 = arith.constant 3.000000e-01 : f32
    %93 = vector.broadcast %cst_45 : f32 to vector<16x128xf32>
    %94 = arith.mulf %93, %92 : vector<16x128xf32>
    %95 = arith.addf %91, %94 : vector<16x128xf32>
    %c0_46 = arith.constant 0 : index
    %c0_47 = arith.constant 0 : index
    %96 = vector.load %arg11[%c0_46, %c0_47] : memref<16x128xf32, #tpu.memory_space<vmem>>, vector<16x128xf32>
    tpu.vector_store %arg11[%c0_46, %c0_47], %95 {strides = array<i32>} : memref<16x128xf32, #tpu.memory_space<vmem>>, vector<16x128xf32>,
    %c0_48 = arith.constant 0 : index
    %c0_49 = arith.constant 0 : index
    %97 = vector.load %arg13[%c0_48, %c0_49] : memref<1x128xf32, #tpu.memory_space<vmem>>, vector<1x128xf32>
    tpu.vector_store %arg13[%c0_48, %c0_49], %66 {strides = array<i32>} : memref<1x128xf32, #tpu.memory_space<vmem>>, vector<1x128xf32>,
    %c0_50 = arith.constant 0 : index
    %c0_51 = arith.constant 0 : index
    %98 = vector.load %arg15[%c0_50, %c0_51] : memref<1x128xf32, #tpu.memory_space<vmem>>, vector<1x128xf32>
    tpu.vector_store %arg15[%c0_50, %c0_51], %80 {strides = array<i32>} : memref<1x128xf32, #tpu.memory_space<vmem>>, vector<1x128xf32>,
    %c0_52 = arith.constant 0 : index
    %c0_53 = arith.constant 0 : index
    %99 = vector.load %arg5[%c0_52, %c0_53] : memref<1x128xf32, #tpu.memory_space<vmem>>, vector<1x128xf32>
    %100 = vector.broadcast %99 : vector<1x128xf32> to vector<16x128xf32>
    %101 = arith.addf %95, %100 : vector<16x128xf32>
    %c0_54 = arith.constant 0 : index
    %c0_55 = arith.constant 0 : index
    %102 = vector.load %arg6[%c0_54, %c0_55] : memref<1x128xf32, #tpu.memory_space<vmem>>, vector<1x128xf32>
    %103 = tpu.iota {dimensions = array<i32: 1>} : vector<1x128xi32>
    %c8_i32 = arith.constant 8 : i32
    %104 = vector.broadcast %c8_i32 : i32 to vector<1x128xi32>
    %105 = arith.cmpi slt, %103, %104 : vector<1x128xi32>
    %106 = vector.broadcast %102 : vector<1x128xf32> to vector<16x128xf32>
    %107 = arith.mulf %106, %101 : vector<16x128xf32>
    %cst_56 = arith.constant -1.000000e+30 : f32
    %108 = vector.shape_cast %105 : vector<1x128xi1> to vector<1x128xi1>
    %109 = vector.broadcast %108 : vector<1x128xi1> to vector<16x128xi1>
    %110 = vector.broadcast %cst_56 : f32 to vector<16x128xf32>
    %111 = arith.select %109, %107, %110 : vector<16x128xi1>, vector<16x128xf32>
    %cst_57 = arith.constant dense<0xFF800000> : vector<16xf32>
    %112 = vector.multi_reduction <maximumf>, %111, %cst_57 [1] : vector<16x128xf32> to vector<16xf32>
    %113 = vector.shape_cast %112 : vector<16xf32> to vector<16x1xf32>
    %114 = vector.broadcast %113 : vector<16x1xf32> to vector<16x128xf32>
    %115 = arith.subf %111, %114 : vector<16x128xf32>
    %116 = math.exp %115 : vector<16x128xf32>
    %cst_58 = arith.constant dense<0.000000e+00> : vector<16xf32>
    %117 = vector.multi_reduction <add>, %116, %cst_58 [1] : vector<16x128xf32> to vector<16xf32>
    %118 = vector.shape_cast %117 : vector<16xf32> to vector<16x1xf32>
    %119 = vector.broadcast %118 : vector<16x1xf32> to vector<16x128xf32>
    %120 = arith.divf %116, %119 : vector<16x128xf32>
    %c0_59 = arith.constant 0 : index
    %c0_60 = arith.constant 0 : index
    %121 = vector.load %arg16[%c0_59, %c0_60] : memref<16x128xf32, #tpu.memory_space<vmem>>, vector<16x128xf32>
    tpu.vector_store %arg16[%c0_59, %c0_60], %120 {strides = array<i32>} : memref<16x128xf32, #tpu.memory_space<vmem>>, vector<16x128xf32>,
    return
  }
}

</mosaic_0001>

<bundles_post_ra>
// kernel: tpu_custom_call.1
= control target key start
LH: loop header
LB: loop body
LE: loop exit
PB: predicated region body
PF: predicated region fallthrough
CT: control target
= control target key end

     0   :  { %s1222_s0 = inlined_call_operand.hbm [shape: f32[16,128], index: 0, kind: input, shape index: {}]   ;;  %s1223_s1 = inlined_call_operand.hbm [shape: f32[16,128], index: 1, kind: input, shape index: {}]   ;;  %s1224_s2 = inlined_call_operand.hbm [shape: f32[128,128], index: 2, kind: input, shape index: {}]   ;;  %s1225_s3 = inlined_call_operand.hbm [shape: f32[128,128], index: 3, kind: input, shape index: {}]   ;;  %s1226_s4 = inlined_call_operand.vmem [shape: f32[1,128], index: 4, kind: input, shape index: {}]   ;;  %s1227_s5 = inlined_call_operand.vmem [shape: f32[1,128], index: 5, kind: input, shape index: {}]   ;;  %s1228_s6 = inlined_call_operand.vmem [shape: f32[1,128], index: 6, kind: input, shape index: {}]   ;;  %s1229_s7 = inlined_call_operand.hbm [shape: f32[16,128], index: 7, kind: input, shape index: {}]   ;;  %s1230_s8 = inlined_call_operand.hbm [shape: f32[16,128], index: 8, kind: input, shape index: {}]   ;;  %s1231_s9 = inlined_call_operand.hbm [shape: f32[16,128], index: 9, kind: output, shape index: {0}]   ;;  %s1232_s10 = inlined_call_operand.hbm [shape: f32[16,128], index: 10, kind: output, shape index: {1}]   ;;  %s1233_s11 = inlined_call_operand.hbm [shape: f32[16,128], index: 11, kind: output, shape index: {2}]   ;;  %s1234_s12 = inlined_call_operand.hbm [shape: f32[1,128], index: 12, kind: output, shape index: {3}]   ;;  %s1235_s13 = inlined_call_operand.hbm [shape: f32[1,128], index: 13, kind: output, shape index: {4}]   ;;  %s1236_s14 = inlined_call_operand.hbm [shape: f32[1,128], index: 14, kind: output, shape index: {5}]   ;;  %s1237_s15 = inlined_call_operand.hbm [shape: f32[1,128], index: 15, kind: output, shape index: {6}]   ;;  %s1238_s16 = inlined_call_operand.hbm [shape: f32[16,128], index: 16, kind: output, shape index: {7}]  }
   0x1   :  { %1239 = sst [smem:[#allocation34_spill]] %s1222_s0 }
   0x2   :  { %22 = vsyncpa [#allocation3], 0 }
   0x3   :  { %23 = vsyncpa [#allocation6], 0 }
   0x4   :  { %24 = vsyncpa [#allocation9], 0 }
   0x5   :  { %25 = vsyncpa [#allocation12], 0 }
   0x6   :  { %26 = vsyncpa [#allocation4], 0 }
   0x7   :  { %27 = vsyncpa [#allocation15], 0 }
   0x8   :  { %28 = vsyncpa [#allocation18], 0 }
   0x9   :  { %29 = vsyncpa [#allocation21], 0 }
   0xa   :  { %30 = vsyncpa [#allocation24], 0  ;;  %s1032_s21 = smov [#allocation5]   ;;  %s1033_s23 = smov [#allocation8]  }
   0xb   :  { %s48_s22 = sshll.u32 %s1032_s21, 4  ;;  %s72_s24 = sshll.u32 %s1033_s23, 4  ;;  %s49_s22 = int_to_ptr.vmem [resolvable:$true] %s48_s22  ;;  %s73_s24 = int_to_ptr.vmem [resolvable:$true] %s72_s24 }
   0xc   :  { %s742_s25 = scalar_lea.vmem %s49_s22, 256  ;;  %p747_p1 = scmp.lt.s32.totalorder %s49_s22, %s49_s22 }
   0xd   :  { %p743_p0 = scmp.ne.s32.totalorder %s49_s22, %s742_s25  ;;  %p748_p2 = scmp.lt.s32.totalorder %s742_s25, %s742_s25 }
   0xf   :  { %p749_p3 = por %p748_p2, %p747_p1 }
  0x11   :  { %p750_p4 = pnand %p749_p3, %p743_p0 }
  0x13   :  { %753 = shalt.err (!%p750_p4)
}
  0x14   :  { %s1034_s26 = smov 128   ;;  %s1035_s27 = smov 8  }
  0x15   :  { %54 = dma.hbm_to_vmem [thread:$0]  %s1223_s1, 256, %s49_s22, [#allocation6], %s1034_s26, %s1034_s26, %s1035_s27  }
  0x16   :  { %s762_s30 = scalar_lea.vmem %s73_s24, 2048  ;;  %p767_p6 = scmp.lt.s32.totalorder %s73_s24, %s73_s24 }
  0x17   :  { %p763_p5 = scmp.ne.s32.totalorder %s73_s24, %s762_s30  ;;  %p768_p7 = scmp.lt.s32.totalorder %s762_s30, %s762_s30 }
  0x19   :  { %p769_p8 = por %p768_p7, %p767_p6 }
  0x1b   :  { %p770_p9 = pnand %p769_p8, %p763_p5 }
  0x1d   :  { %773 = shalt.err (!%p770_p9)
}
  0x1e   :  { %78 = dma.hbm_to_vmem [thread:$0]  %s1225_s3, 2048, %s73_s24, [#allocation9], %s1034_s26, %s1034_s26, %s1035_s27  }
  0x1f   :  { %s1036_s18 = smov [#allocation2]   ;;  %s1037_s20 = smov [#allocation7]  }
  0x20   :  { %s36_s19 = sshll.u32 %s1036_s18, 4  ;;  %s60_s21 = sshll.u32 %s1037_s20, 4  ;;  %s37_s19 = int_to_ptr.vmem [resolvable:$true] %s36_s19  ;;  %s61_s21 = int_to_ptr.vmem [resolvable:$true] %s60_s21 }
  0x21   :  { %s782_s1 = scalar_lea.vmem %s37_s19, 256  ;;  %p787_p11 = scmp.lt.s32.totalorder %s37_s19, %s37_s19 }
  0x22   :  { %p783_p10 = scmp.ne.s32.totalorder %s37_s19, %s782_s1  ;;  %p788_p12 = scmp.lt.s32.totalorder %s782_s1, %s782_s1 }
  0x24   :  { %p789_p13 = por %p788_p12, %p787_p11 }
  0x26   :  { %p790_p0 = pnand %p789_p13, %p783_p10 }
  0x28   :  { %793 = shalt.err (!%p790_p0)
}
  0x29   :  { %s1240_s25 = sld [smem:[#allocation34_spill]]  ;;  %s802_s3 = scalar_lea.vmem %s61_s21, 2048 }
  0x2a   :  { %p803_p1 = scmp.ne.s32.totalorder %s61_s21, %s802_s3  ;;  %p807_p2 = scmp.lt.s32.totalorder %s61_s21, %s61_s21 }
  0x2b   :  { %p808_p3 = scmp.lt.s32.totalorder %s802_s3, %s802_s3 }
  0x2d   :  { %p809_p4 = por %p808_p3, %p807_p2 }
  0x2f   :  { %42 = dma.hbm_to_vmem [thread:$0]  %s1240_s25, 256, %s37_s19, [#allocation3], %s1034_s26, %s1034_s26, %s1035_s27  }
  0x30   :  { %p810_p5 = pnand %p809_p4, %p803_p1 }
  0x32   :  { %813 = shalt.err (!%p810_p5)
}
  0x33   :  { %66 = dma.hbm_to_vmem [thread:$0]  %s1224_s2, 2048, %s61_s21, [#allocation6], %s1034_s26, %s1034_s26, %s1035_s27  }
  0x34   :  { %s1038_s29 = smov [#allocation10]   ;;  %s1039_s0 = smov [#allocation11]  }
  0x35   :  { %s90_s30 = sshll.u32 %s1038_s29, 4  ;;  %s102_s17 = sshll.u32 %s1039_s0, 4  ;;  %s91_s30 = int_to_ptr.vmem [resolvable:$true] %s90_s30  ;;  %s103_s17 = int_to_ptr.vmem [resolvable:$true] %s102_s17 }
  0x36   :  { %s822_s18 = scalar_lea.vmem %s91_s30, 256  ;;  %p827_p7 = scmp.lt.s32.totalorder %s91_s30, %s91_s30 }
  0x37   :  { %p823_p6 = scmp.ne.s32.totalorder %s91_s30, %s822_s18  ;;  %p828_p8 = scmp.lt.s32.totalorder %s822_s18, %s822_s18 }
  0x39   :  { %p829_p9 = por %p828_p8, %p827_p7 }
  0x3b   :  { %p830_p10 = pnand %p829_p9, %p823_p6 }
  0x3d   :  { %833 = shalt.err (!%p830_p10)
}
  0x3e   :  { %96 = dma.hbm_to_vmem [thread:$0]  %s1229_s7, 256, %s91_s30, [#allocation9], %s1034_s26, %s1034_s26, %s1035_s27  }
  0x3f   :  { %s842_s2 = scalar_lea.vmem %s103_s17, 256  ;;  %p847_p12 = scmp.lt.s32.totalorder %s103_s17, %s103_s17 }
  0x40   :  { %p843_p11 = scmp.ne.s32.totalorder %s103_s17, %s842_s2  ;;  %p848_p13 = scmp.lt.s32.totalorder %s842_s2, %s842_s2 }
  0x42   :  { %p849_p0 = por %p848_p13, %p847_p12 }
  0x44   :  { %p850_p1 = pnand %p849_p0, %p843_p11 }
  0x46   :  { %853 = shalt.err (!%p850_p1)
}
  0x47   :  { %108 = dma.hbm_to_vmem [thread:$0]  %s1230_s8, 256, %s103_s17, [#allocation12], %s1034_s26, %s1034_s26, %s1035_s27  }
  0x48   :  { %1014 = dma.done.wait [#allocation3], 256  }
  0x49   :  { %1015 = vsyncadd [#allocation3], 4294967040 }
  0x4a   :  { %1016 = dma.done.wait [#allocation6], 2304  }
  0x4b   :  { %1017 = vsyncadd [#allocation6], 4294964992 }
  0x4c   :  { %1018 = dma.done.wait [#allocation9], 2304  }
  0x4d   :  { %1019 = vsyncadd [#allocation9], 4294964992 }
  0x4e   :  { %1020 = dma.done.wait [#allocation12], 256  }
  0x4f   :  { %1021 = vsyncadd [#allocation12], 4294967040  ;;  %v152_v0 = vld [vmem:[#allocation7 + $0x78] sm:$0xff]  ;;  %v151_v1 = vld [vmem:[#allocation7 + $0x70] sm:$0xff]  ;;  %s1041_s3 = smov [#allocation17]  }
  0x50   :  { %632 = vmatprep.subr.mxu0 %v152_v0  ;;  %v150_v2 = vld [vmem:[#allocation7 + $0x68] sm:$0xff]  ;;  %v149_v3 = vld [vmem:[#allocation7 + $0x60] sm:$0xff]  ;;  %v129_v5 = vld [vmem:[#allocation5] sm:$0xff]  ;;  %s514_s24 = sshll.u32 %s1041_s3, 4  ;;  %s515_s24 = int_to_ptr.vmem [resolvable:$true] %s514_s24 }
  0x51   :  { %633 = vmatpush3.msra.mxu0 %v152_v0  ;;  %v127_v4 = vld [vmem:[#allocation2] sm:$0xff]  ;;  %v148_v6 = vld [vmem:[#allocation7 + $0x58] sm:$0xff]  ;;  %v131_v7 = vmul.f32 0.3, %v129_v5  ;;  %v128_v8 = vld [vmem:[#allocation2 + $0x8] sm:$0xff] }
  0x52   :  { %634 = vmatprep.subr.mxu0 %v151_v1  ;;  %v130_v9 = vld [vmem:[#allocation5 + $0x8] sm:$0xff]  ;;  %v147_v11 = vld [vmem:[#allocation7 + $0x50] sm:$0xff]  ;;  %v146_v14 = vld [vmem:[#allocation7 + $0x48] sm:$0xff] }
  0x53   :  { %635 = vmatpush3.msra.mxu0 %v151_v1  ;;  %v132_v10 = vmul.f32 0.3, %v130_v9  ;;  %v133_v12 = vadd.f32 %v131_v7, %v127_v4  ;;  %v145_v15 = vld [vmem:[#allocation7 + $0x40] sm:$0xff]  ;;  %v144_v16 = vld [vmem:[#allocation7 + $0x38] sm:$0xff]  ;;  %v143_v17 = vld [vmem:[#allocation7 + $0x30] sm:$0xff] }
  0x54   :  { %636 = vmatprep.subr.mxu0 %v150_v2  ;;  %v142_v18 = vld [vmem:[#allocation7 + $0x28] sm:$0xff]  ;;  %v141_v19 = vld [vmem:[#allocation7 + $0x20] sm:$0xff]  ;;  %v140_v20 = vld [vmem:[#allocation7 + $0x18] sm:$0xff] }
  0x55   :  { %637 = vmatpush3.msra.mxu0 %v150_v2  ;;  %v134_v13 = vadd.f32 %v132_v10, %v128_v8  ;;  %664 = vmatprep.mubr.f32.mxu0 %v133_v12  ;;  %135 = vst [vmem:[#allocation13] sm:$0xff] %v133_v12  ;;  %v139_v21 = vld [vmem:[#allocation7 + $0x10] sm:$0xff]  ;;  %v138_v22 = vld [vmem:[#allocation7 + $0x8] sm:$0xff]  ;;  %v137_v23 = vld [vmem:[#allocation7] sm:$0xff] }
  0x56   :  { %638 = vmatprep.subr.mxu0 %v149_v3  ;;  %v303_v24 = vld [vmem:[#allocation8 + $0x78] sm:$0xff]  ;;  %v302_v25 = vld [vmem:[#allocation8 + $0x70] sm:$0xff]  ;;  %v301_v26 = vld [vmem:[#allocation8 + $0x68] sm:$0xff] }
  0x57   :  { %639 = vmatpush3.msra.mxu0 %v149_v3  ;;  %136 = vst [vmem:[#allocation13 + $0x8] sm:$0xff] %v134_v13  ;;  %667 = vmatprep.subr.mxu1 %v303_v24  ;;  %v300_v27 = vld [vmem:[#allocation8 + $0x60] sm:$0xff]  ;;  %v299_v28 = vld [vmem:[#allocation8 + $0x58] sm:$0xff]  ;;  %v298_v29 = vld [vmem:[#allocation8 + $0x50] sm:$0xff] }
  0x58   :  { %640 = vmatprep.subr.mxu0 %v148_v6  ;;  %668 = vmatpush3.msra.mxu1 %v303_v24  ;;  %v297_v30 = vld [vmem:[#allocation8 + $0x48] sm:$0xff]  ;;  %v296_v31 = vld [vmem:[#allocation8 + $0x40] sm:$0xff]  ;;  %v295_v32 = vld [vmem:[#allocation8 + $0x38] sm:$0xff] }
  0x59   :  { %641 = vmatpush3.msra.mxu0 %v148_v6  ;;  %669 = vmatprep.subr.mxu1 %v302_v25  ;;  %v294_v33 = vld [vmem:[#allocation8 + $0x30] sm:$0xff]  ;;  %v293_v34 = vld [vmem:[#allocation8 + $0x28] sm:$0xff]  ;;  %v292_v35 = vld [vmem:[#allocation8 + $0x20] sm:$0xff] }
  0x5a   :  { %642 = vmatprep.subr.mxu0 %v147_v11  ;;  %670 = vmatpush3.msra.mxu1 %v302_v25  ;;  %v291_v36 = vld [vmem:[#allocation8 + $0x18] sm:$0xff]  ;;  %v290_v37 = vld [vmem:[#allocation8 + $0x10] sm:$0xff]  ;;  %v289_v38 = vld [vmem:[#allocation8 + $0x8] sm:$0xff] }
  0x5b   :  { %643 = vmatpush3.msra.mxu0 %v147_v11  ;;  %671 = vmatprep.subr.mxu1 %v301_v26  ;;  %v288_v39 = vld [vmem:[#allocation8] sm:$0xff]  ;;  %v268_v12 = vld [vmem:[#allocation10 + $0x8] sm:$0xff] }
  0x5c   :  { %644 = vmatprep.subr.mxu0 %v146_v14  ;;  %672 = vmatpush3.msra.mxu1 %v301_v26 }
  0x5d   :  { %645 = vmatpush3.msra.mxu0 %v146_v14  ;;  %673 = vmatprep.subr.mxu1 %v300_v27  ;;  %v270_v14 = vmul.f32 0.3, %v268_v12 }
  0x5e   :  { %646 = vmatprep.subr.mxu0 %v145_v15  ;;  %674 = vmatpush3.msra.mxu1 %v300_v27 }
  0x5f   :  { %647 = vmatpush3.msra.mxu0 %v145_v15  ;;  %675 = vmatprep.subr.mxu1 %v299_v28 }
  0x60   :  { %648 = vmatprep.subr.mxu0 %v144_v16  ;;  %676 = vmatpush3.msra.mxu1 %v299_v28 }
  0x61   :  { %649 = vmatpush3.msra.mxu0 %v144_v16  ;;  %677 = vmatprep.subr.mxu1 %v298_v29 }
  0x62   :  { %650 = vmatprep.subr.mxu0 %v143_v17  ;;  %678 = vmatpush3.msra.mxu1 %v298_v29 }
  0x63   :  { %651 = vmatpush3.msra.mxu0 %v143_v17  ;;  %679 = vmatprep.subr.mxu1 %v297_v30 }
  0x64   :  { %652 = vmatprep.subr.mxu0 %v142_v18  ;;  %680 = vmatpush3.msra.mxu1 %v297_v30 }
  0x65   :  { %653 = vmatpush3.msra.mxu0 %v142_v18  ;;  %681 = vmatprep.subr.mxu1 %v296_v31 }
  0x66   :  { %654 = vmatprep.subr.mxu0 %v141_v19  ;;  %682 = vmatpush3.msra.mxu1 %v296_v31 }
  0x67   :  { %655 = vmatpush3.msra.mxu0 %v141_v19  ;;  %683 = vmatprep.subr.mxu1 %v295_v32 }
  0x68   :  { %656 = vmatprep.subr.mxu0 %v140_v20  ;;  %684 = vmatpush3.msra.mxu1 %v295_v32 }
  0x69   :  { %657 = vmatpush3.msra.mxu0 %v140_v20  ;;  %685 = vmatprep.subr.mxu1 %v294_v33 }
  0x6a   :  { %658 = vmatprep.subr.mxu0 %v139_v21  ;;  %686 = vmatpush3.msra.mxu1 %v294_v33 }
  0x6b   :  { %659 = vmatpush3.msra.mxu0 %v139_v21  ;;  %687 = vmatprep.subr.mxu1 %v293_v34  ;;  %v593_v21 = vld [vmem:[%s1226_s4] ss:$0 sm:$0xff] }
  0x6c   :  { %660 = vmatprep.subr.mxu0 %v138_v22  ;;  %688 = vmatpush3.msra.mxu1 %v293_v34 }
  0x6d   :  { %661 = vmatpush3.msra.mxu0 %v138_v22  ;;  %689 = vmatprep.subr.mxu1 %v292_v35 }
  0x6e   :  { %662 = vmatprep.subr.mxu0 %v137_v23  ;;  %690 = vmatpush3.msra.mxu1 %v292_v35 }
  0x6f   :  { %663 = vmatpush3.msra.mxu0 %v137_v23  ;;  %691 = vmatprep.subr.mxu1 %v291_v36 }
  0x70   :  { %665 = vmatmul.mubr.f32.vlgmr.msra.gmra.mxu0 %v134_v13  ;;  %692 = vmatpush3.msra.mxu1 %v291_v36  ;;  %v267_v13 = vld [vmem:[#allocation10] sm:$0xff] }
  0x71   :  { %693 = vmatprep.subr.mxu1 %v290_v37  ;;  %v269_v17 = vmul.f32 0.3, %v267_v13 }
  0x72   :  { %694 = vmatpush3.msra.mxu1 %v290_v37 }
  0x73   :  { %695 = vmatprep.subr.mxu1 %v289_v38 }
  0x74   :  { %696 = vmatpush3.msra.mxu1 %v289_v38 }
  0x75   :  { %697 = vmatprep.subr.mxu1 %v288_v39 }
  0x76   :  { %698 = vmatpush3.msra.mxu1 %v288_v39 }
 0x130   :  { %v666_v40 = vpop.f32.mrf.mxu0 }
 0x131   :  { %v236_v41 = vrot.slane %v666_v40, 4 }
 0x132   :  { %v219_v42 = vpop.f32.mrf.mxu0 }
 0x133   :  { %v237_v43 = vadd.f32 %v666_v40, %v236_v41  ;;  %v228_v44 = vrot.slane %v219_v42, 4 }
 0x135   :  { %v238_v45 = vrot.slane %v237_v43, 2  ;;  %v229_v46 = vadd.f32 %v228_v44, %v219_v42 }
 0x137   :  { %v239_v47 = vadd.f32 %v238_v45, %v237_v43  ;;  %v230_v48 = vrot.slane %v229_v46, 2 }
 0x139   :  { %v240_v49 = vrot.slane %v239_v47, 1  ;;  %v231_v50 = vadd.f32 %v230_v48, %v229_v46 }
 0x13b   :  { %v241_v51 = vadd.f32 %v240_v49, %v239_v47  ;;  %v232_v52 = vrot.slane %v231_v50, 1 }
 0x13d   :  { %v242_v53 = vmul.f32 0.125, %v241_v51  ;;  %v233_v54 = vadd.f32 %v232_v52, %v231_v50 }
 0x13f   :  { %v244_v55 = vsub.f32 %v666_v40, %v242_v53  ;;  %275 = vst [vmem:[#allocation17] sm:$0x1] %v242_v53  ;;  %v235_v56 = vmul.f32 0.125, %v233_v54 }
 0x141   :  { %v253_v57 = vmul.f32 %v244_v55, %v244_v55  ;;  %v243_v58 = vsub.f32 %v219_v42, %v235_v56 }
 0x143   :  { %v254_v59 = vrot.slane %v253_v57, 4  ;;  %v245_v60 = vmul.f32 %v243_v58, %v243_v58 }
 0x145   :  { %v255_v61 = vadd.f32 %v254_v59, %v253_v57  ;;  %v246_v62 = vrot.slane %v245_v60, 4 }
 0x147   :  { %v256_v63 = vrot.slane %v255_v61, 2  ;;  %v247_v0 = vadd.f32 %v246_v62, %v245_v60 }
 0x149   :  { %v257_v1 = vadd.f32 %v256_v63, %v255_v61  ;;  %v248_v2 = vrot.slane %v247_v0, 2  ;;  %v418_v63 = vld [vmem:[#allocation11 + $0x8] sm:$0xff] }
 0x14b   :  { %v258_v3 = vrot.slane %v257_v1, 1  ;;  %v249_v4 = vadd.f32 %v248_v2, %v247_v0  ;;  %v417_v0 = vld [vmem:[#allocation11] sm:$0xff] }
 0x14d   :  { %v259_v5 = vadd.f32 %v258_v3, %v257_v1  ;;  %v250_v6 = vrot.slane %v249_v4, 1  ;;  %v420_v1 = vmul.f32 0.3, %v418_v63 }
 0x14f   :  { %v260_v7 = vmul.f32 0.14285715, %v259_v5  ;;  %v251_v8 = vadd.f32 %v250_v6, %v249_v4  ;;  %v419_v4 = vmul.f32 0.3, %v417_v0  ;;  %v437_v6 = vlaneseq }
 0x151   :  { %v263_v9 = vadd.f32 1e-10, %v260_v7  ;;  %276 = vst [vmem:[#allocation20] sm:$0x1] %v260_v7  ;;  %v252_v10 = vmul.f32 0.14285715, %v251_v8 }
 0x153   :  { %718 = vrsqrt.f32 %v263_v9  ;;  %v261_v11 = vadd.f32 1e-10, %v252_v10  ;;  %v594_v9 = vld [vmem:[%s1227_s5] ss:$0 sm:$0xff]  ;;  %s1040_s5 = smov [#allocation14]  }
 0x155   :  { %720 = vrsqrt.f32 %v261_v11  ;;  %v438_v11 = vand.u32 127, %v437_v6 }
 0x157   :  { %vm439_vm0 = vcmp.lt.s32.totalorder %v438_v11, 8 }
 0x160   :  { %v719_v15 = vpop.eup %718 }
 0x161   :  { %v266_v16 = vmul.f32 %v719_v15, %v244_v55 }
 0x162   :  { %v721_v18 = vpop.eup %720 }
 0x163   :  { %v265_v19 = vmul.f32 %v721_v18, %v243_v58  ;;  %v272_v20 = vadd.f32 %v270_v14, %v266_v16  ;;  %v595_v14 = vld [vmem:[%s1228_s6] ss:$0 sm:$0xff]  ;;  %s489_s6 = sshll.u32 %s1040_s5, 4  ;;  %s490_s6 = int_to_ptr.vmem [resolvable:$true] %s489_s6 }
 0x164   :  { %s854_s28 = scalar_lea.vmem %s490_s6, 256  ;;  %p859_p3 = scmp.lt.s32.totalorder %s490_s6, %s490_s6 }
 0x165   :  { %v271_v22 = vadd.f32 %v269_v17, %v265_v19  ;;  %274 = vst [vmem:[#allocation14 + $0x8] sm:$0xff] %v272_v20  ;;  %v285_v23 = vadd.f32 %v593_v21, %v272_v20  ;;  %p855_p2 = scmp.ne.s32.totalorder %s490_s6, %s854_s28  ;;  %p860_p4 = scmp.lt.s32.totalorder %s854_s28, %s854_s28 }
 0x167   :  { %v284_v24 = vadd.f32 %v593_v21, %v271_v22  ;;  %273 = vst [vmem:[#allocation14] sm:$0xff] %v271_v22  ;;  %v287_v26 = vmax.f32 %v285_v23, 0.0  ;;  %p861_p5 = por %p860_p4, %p859_p3 }
 0x169   :  { %v286_v25 = vmax.f32 %v284_v24, 0.0  ;;  %p862_p6 = pnand %p861_p5, %p855_p2 }
 0x16b   :  { %699 = vmatprep.mubr.f32.mxu1 %v286_v25 }
 0x16c   :  { %700 = vmatmul.mubr.f32.vlgmr.msra.gmra.mxu1 %v287_v26 }
 0x22c   :  { %v701_v27 = vpop.f32.mrf.mxu1 }
 0x22d   :  { %v386_v28 = vrot.slane %v701_v27, 4 }
 0x22e   :  { %v370_v29 = vpop.f32.mrf.mxu1 }
 0x22f   :  { %v387_v30 = vadd.f32 %v701_v27, %v386_v28  ;;  %v379_v31 = vrot.slane %v370_v29, 4 }
 0x231   :  { %v388_v32 = vrot.slane %v387_v30, 2  ;;  %v380_v33 = vadd.f32 %v379_v31, %v370_v29 }
 0x233   :  { %v389_v34 = vadd.f32 %v388_v32, %v387_v30  ;;  %v381_v35 = vrot.slane %v380_v33, 2 }
 0x235   :  { %v390_v36 = vrot.slane %v389_v34, 1  ;;  %v382_v37 = vadd.f32 %v381_v35, %v380_v33 }
 0x237   :  { %v391_v38 = vadd.f32 %v390_v36, %v389_v34  ;;  %v383_v39 = vrot.slane %v382_v37, 1 }
 0x239   :  { %v392_v40 = vmul.f32 0.125, %v391_v38  ;;  %v384_v41 = vadd.f32 %v383_v39, %v382_v37 }
 0x23b   :  { %v394_v42 = vsub.f32 %v701_v27, %v392_v40  ;;  %425 = vst [vmem:[#allocation19] sm:$0x1] %v392_v40  ;;  %v385_v43 = vmul.f32 0.125, %v384_v41 }
 0x23d   :  { %v403_v44 = vmul.f32 %v394_v42, %v394_v42  ;;  %v393_v45 = vsub.f32 %v370_v29, %v385_v43 }
 0x23f   :  { %v404_v46 = vrot.slane %v403_v44, 4  ;;  %v395_v47 = vmul.f32 %v393_v45, %v393_v45 }
 0x241   :  { %v405_v48 = vadd.f32 %v404_v46, %v403_v44  ;;  %v396_v49 = vrot.slane %v395_v47, 4 }
 0x243   :  { %v406_v50 = vrot.slane %v405_v48, 2  ;;  %v397_v51 = vadd.f32 %v396_v49, %v395_v47 }
 0x245   :  { %v407_v52 = vadd.f32 %v406_v50, %v405_v48  ;;  %v398_v53 = vrot.slane %v397_v51, 2 }
 0x247   :  { %v408_v54 = vrot.slane %v407_v52, 1  ;;  %v399_v55 = vadd.f32 %v398_v53, %v397_v51 }
 0x249   :  { %v409_v56 = vadd.f32 %v408_v54, %v407_v52  ;;  %v400_v57 = vrot.slane %v399_v55, 1 }
 0x24b   :  { %v410_v58 = vmul.f32 0.14285715, %v409_v56  ;;  %v401_v59 = vadd.f32 %v400_v57, %v399_v55 }
 0x24d   :  { %v413_v60 = vadd.f32 1e-10, %v410_v58  ;;  %426 = vst [vmem:[#allocation22] sm:$0x1] %v410_v58  ;;  %v402_v61 = vmul.f32 0.14285715, %v401_v59 }
 0x24f   :  { %722 = vrsqrt.f32 %v413_v60  ;;  %v411_v62 = vadd.f32 1e-10, %v402_v61 }
 0x251   :  { %724 = vrsqrt.f32 %v411_v62 }
 0x25c   :  { %v723_v2 = vpop.eup %722 }
 0x25d   :  { %v416_v3 = vmul.f32 %v723_v2, %v394_v42 }
 0x25e   :  { %v725_v5 = vpop.eup %724 }
 0x25f   :  { %v415_v7 = vmul.f32 %v725_v5, %v393_v45  ;;  %v422_v8 = vadd.f32 %v420_v1, %v416_v3 }
 0x261   :  { %v421_v10 = vadd.f32 %v419_v4, %v415_v7  ;;  %424 = vst [vmem:[#allocation16 + $0x8] sm:$0xff] %v422_v8  ;;  %v435_v13 = vadd.f32 %v594_v9, %v422_v8 }
 0x263   :  { %423 = vst [vmem:[#allocation16] sm:$0xff] %v421_v10  ;;  %v434_v12 = vadd.f32 %v594_v9, %v421_v10  ;;  %v447_v17 = vmul.f32 %v595_v14, %v435_v13 }
 0x265   :  { %v446_v15 = vmul.f32 %v595_v14, %v434_v12  ;;  %v451_v18 = vsel %vm439_vm0, %v447_v17, -1e+30 }
 0x267   :  { %v450_v16 = vsel %vm439_vm0, %v446_v15, -1e+30 }
 0x268   :  { %452 = vmax.xlane.f32.xlu0 %v450_v16 }
 0x26c   :  { %454 = vmax.xlane.f32.xlu0 %v451_v18 }
 0x2f1   :  { %v453_v19 = vpop.xlane.xlu0 %452 }
 0x2f2   :  { %v456_v20 = vsub.f32 %v450_v16, %v453_v19 }
 0x2f4   :  { %v458_v21 = vmul.f32 1.442695, %v456_v20 }
 0x2f5   :  { %v455_v22 = vpop.xlane.xlu0 %454 }
 0x2f6   :  { %726 = vpow2.f32 %v458_v21  ;;  %v457_v23 = vsub.f32 %v451_v18, %v455_v22 }
 0x2f8   :  { %v460_v24 = vmul.f32 1.442695, %v457_v23 }
 0x2fa   :  { %728 = vpow2.f32 %v460_v24 }
 0x303   :  { %v1178_v25 = vpop.eup %726 }
 0x304   :  { %462 = vadd.xlane.f32.xlu1 %v1178_v25 }
 0x307   :  { %v1181_v26 = vpop.eup %728 }
 0x308   :  { %464 = vadd.xlane.f32.xlu1 %v1181_v26 }
 0x309   :  { %865 = shalt.err (!%p862_p6)
}
 0x30a   :  { %495 = dma.vmem_to_hbm [thread:$0]  %s490_s6, 256, %s1232_s10, [#allocation15], %s1034_s26, %s1034_s26, %s1035_s27  }
 0x30b   :  { %s874_s0 = scalar_lea.vmem %s515_s24, 16  ;;  %s878_s17 = scalar_lea.vmem %s515_s24, 32 }
 0x30c   :  { %p875_p7 = scmp.ne.s32.totalorder %s515_s24, %s874_s0  ;;  %p879_p8 = scmp.lt.s32.totalorder %s515_s24, %s515_s24 }
 0x30d   :  { %p880_p9 = scmp.lt.s32.totalorder %s878_s17, %s874_s0 }
 0x30f   :  { %p881_p10 = por %p880_p9, %p879_p8 }
 0x311   :  { %p882_p11 = pnand %p881_p10, %p875_p7 }
 0x313   :  { %885 = shalt.err (!%p882_p11)
}
 0x314   :  { %517 = dma.vmem_to_hbm [thread:$0]  %s515_s24, 16, %s1234_s12, [#allocation18]  }
 0x315   :  { %s1042_s20 = smov [#allocation20]   ;;  %s1043_s21 = smov [#allocation13]  }
 0x316   :  { %s534_s2 = sshll.u32 %s1042_s20, 4  ;;  %s477_s1 = sshll.u32 %s1043_s21, 4  ;;  %s535_s2 = int_to_ptr.vmem [resolvable:$true] %s534_s2  ;;  %s478_s1 = int_to_ptr.vmem [resolvable:$true] %s477_s1 }
 0x317   :  { %s894_s7 = scalar_lea.vmem %s535_s2, 16  ;;  %s898_s10 = scalar_lea.vmem %s535_s2, 32 }
 0x318   :  { %p895_p12 = scmp.ne.s32.totalorder %s535_s2, %s894_s7  ;;  %p899_p13 = scmp.lt.s32.totalorder %s535_s2, %s535_s2 }
 0x319   :  { %p900_p0 = scmp.lt.s32.totalorder %s898_s10, %s894_s7 }
 0x31b   :  { %p901_p1 = por %p900_p0, %p899_p13 }
 0x31d   :  { %p902_p2 = pnand %p901_p1, %p895_p12 }
 0x31f   :  { %905 = shalt.err (!%p902_p2)
}
 0x320   :  { %537 = dma.vmem_to_hbm [thread:$0]  %s535_s2, 16, %s1236_s14, [#allocation21]  }
 0x321   :  { %s914_s22 = scalar_lea.vmem %s478_s1, 256  ;;  %p919_p4 = scmp.lt.s32.totalorder %s478_s1, %s478_s1 }
 0x322   :  { %p915_p3 = scmp.ne.s32.totalorder %s478_s1, %s914_s22  ;;  %p920_p5 = scmp.lt.s32.totalorder %s914_s22, %s914_s22 }
 0x324   :  { %p921_p6 = por %p920_p5, %p919_p4 }
 0x326   :  { %p922_p7 = pnand %p921_p6, %p915_p3 }
 0x328   :  { %925 = shalt.err (!%p922_p7)
}
 0x329   :  { %483 = dma.vmem_to_hbm [thread:$0]  %s478_s1, 256, %s1231_s9, [#allocation4], %s1034_s26, %s1034_s26, %s1035_s27  }
 0x32a   :  { %s1044_s25 = smov [#allocation16]   ;;  %s1045_s6 = smov [#allocation19]  }
 0x32b   :  { %s501_s5 = sshll.u32 %s1044_s25, 4  ;;  %s524_s3 = sshll.u32 %s1045_s6, 4  ;;  %s502_s5 = int_to_ptr.vmem [resolvable:$true] %s501_s5  ;;  %s525_s3 = int_to_ptr.vmem [resolvable:$true] %s524_s3 }
 0x32c   :  { %s934_s14 = scalar_lea.vmem %s502_s5, 256  ;;  %p939_p9 = scmp.lt.s32.totalorder %s502_s5, %s502_s5 }
 0x32d   :  { %p935_p8 = scmp.ne.s32.totalorder %s502_s5, %s934_s14  ;;  %p940_p10 = scmp.lt.s32.totalorder %s934_s14, %s934_s14 }
 0x32f   :  { %p941_p11 = por %p940_p10, %p939_p9 }
 0x331   :  { %p942_p12 = pnand %p941_p11, %p935_p8 }
 0x333   :  { %945 = shalt.err (!%p942_p12)
}
 0x334   :  { %507 = dma.vmem_to_hbm [thread:$0]  %s502_s5, 256, %s1233_s11, [#allocation15], %s1034_s26, %s1034_s26, %s1035_s27  }
 0x335   :  { %s954_s9 = scalar_lea.vmem %s525_s3, 16  ;;  %s958_s29 = scalar_lea.vmem %s525_s3, 32 }
 0x336   :  { %p955_p13 = scmp.ne.s32.totalorder %s525_s3, %s954_s9  ;;  %p959_p0 = scmp.lt.s32.totalorder %s525_s3, %s525_s3 }
 0x337   :  { %p960_p1 = scmp.lt.s32.totalorder %s958_s29, %s954_s9 }
 0x339   :  { %p961_p2 = por %p960_p1, %p959_p0 }
 0x33b   :  { %p962_p3 = pnand %p961_p2, %p955_p13 }
 0x33d   :  { %965 = shalt.err (!%p962_p3)
}
 0x33e   :  { %527 = dma.vmem_to_hbm [thread:$0]  %s525_s3, 16, %s1235_s13, [#allocation18]  }
 0x33f   :  { %s1046_s17 = smov [#allocation22]  }
 0x340   :  { %s544_s18 = sshll.u32 %s1046_s17, 4  ;;  %s545_s18 = int_to_ptr.vmem [resolvable:$true] %s544_s18 }
 0x341   :  { %s974_s19 = scalar_lea.vmem %s545_s18, 16  ;;  %s978_s20 = scalar_lea.vmem %s545_s18, 32 }
 0x342   :  { %p975_p4 = scmp.ne.s32.totalorder %s545_s18, %s974_s19  ;;  %p979_p5 = scmp.lt.s32.totalorder %s545_s18, %s545_s18 }
 0x343   :  { %p980_p6 = scmp.lt.s32.totalorder %s978_s20, %s974_s19 }
 0x345   :  { %p981_p7 = por %p980_p6, %p979_p5 }
 0x347   :  { %p982_p8 = pnand %p981_p7, %p975_p4 }
 0x349   :  { %985 = shalt.err (!%p982_p8)
}
 0x34a   :  { %547 = dma.vmem_to_hbm [thread:$0]  %s545_s18, 16, %s1237_s15, [#allocation21]  }
 0x34b   :  { %s1047_s13 = smov [#allocation23]  }
 0x34c   :  { %s553_s21 = sshll.u32 %s1047_s13, 4  ;;  %s554_s21 = int_to_ptr.vmem [resolvable:$true] %s553_s21 }
 0x34d   :  { %s994_s1 = scalar_lea.vmem %s554_s21, 256  ;;  %p999_p10 = scmp.lt.s32.totalorder %s554_s21, %s554_s21 }
 0x34e   :  { %p995_p9 = scmp.ne.s32.totalorder %s554_s21, %s994_s1  ;;  %p1000_p11 = scmp.lt.s32.totalorder %s994_s1, %s994_s1 }
 0x350   :  { %p1001_p12 = por %p1000_p11, %p999_p10 }
 0x352   :  { %p1002_p13 = pnand %p1001_p12, %p995_p9 }
 0x38d   :  { %v463_v27 = vpop.xlane.xlu1 %462 }
 0x38e   :  { %730 = vrcp.f32 %v463_v27 }
 0x391   :  { %v465_v28 = vpop.xlane.xlu1 %464 }
 0x392   :  { %732 = vrcp.f32 %v465_v28 }
 0x39b   :  { %v731_v29 = vpop.eup %730 }
 0x39c   :  { %v467_v30 = vmul.f32 %v731_v29, %v1178_v25 }
 0x39e   :  { %470 = vst [vmem:[#allocation23] sm:$0xff] %v467_v30 }
 0x39f   :  { %v733_v31 = vpop.eup %732 }
 0x3a0   :  { %v469_v32 = vmul.f32 %v733_v31, %v1181_v26 }
 0x3a2   :  { %471 = vst [vmem:[#allocation23 + $0x8] sm:$0xff] %v469_v32 }
 0x3a3   :  { %1005 = shalt.err (!%p1002_p13)
}
 0x3a4   :  { %559 = dma.vmem_to_hbm [thread:$0]  %s554_s21, 256, %s1238_s16, [#allocation24], %s1034_s26, %s1034_s26, %s1035_s27  }
 0x3a5   :  { %1022 = dma.done.wait [#allocation4], 256  }
 0x3a6   :  { %1023 = vsyncadd [#allocation4], 4294967040 }
 0x3a7   :  { %1024 = dma.done.wait [#allocation15], 512  }
 0x3a8   :  { %1025 = vsyncadd [#allocation15], 4294966784 }
 0x3a9   :  { %1026 = dma.done.wait [#allocation18], 32  }
 0x3aa   :  { %1027 = vsyncadd [#allocation18], 4294967264 }
 0x3ab   :  { %1028 = dma.done.wait [#allocation21], 32  }
 0x3ac   :  { %1029 = vsyncadd [#allocation21], 4294967264 }
 0x3ad   :  { %1030 = dma.done.wait [#allocation24], 256  }
 0x3ae   :  { %1031 = vsyncadd [#allocation24], 4294967040 }
 0x3af   :  { %584 = vsyncpa [#allocation3], 1 }
 0x3b0   :  { %585 = vsyncpa [#allocation6], 1 }
 0x3b1   :  { %586 = vsyncpa [#allocation9], 1 }
 0x3b2   :  { %587 = vsyncpa [#allocation12], 1 }
 0x3b3   :  { %588 = vsyncpa [#allocation4], 1 }
 0x3b4   :  { %589 = vsyncpa [#allocation15], 1 }
 0x3b5   :  { %590 = vsyncpa [#allocation18], 1 }
 0x3b6   :  { %591 = vsyncpa [#allocation21], 1 }
 0x3b7   :  { %592 = vsyncpa [#allocation24], 1 }

</bundles_post_ra>
